<compile_context>
chip_gen: v7x
topology: tpu7x:2x2x1
jax: 0.10.0
libtpu: 0.0.40
codegen_flags: <defaults>
</compile_context>

<pallas_src>
import functools

import jax
import jax.numpy as jnp
from jax.experimental import pallas as pl
from jax.experimental.pallas import tpu as pltpu

NEG_SLOPE = 0.01   # PyTorch F.leaky_relu default
LANE = 128         # TPU lane width
SUBLANE = 8


def _round_up(n, m):
    return ((n + m - 1) // m) * m


def _mlp_kernel(x_ref, *refs):
    # refs = (w1, b1, w2, b2, ..., w7, b7, out_ref)
    out_ref = refs[-1]
    param_refs = refs[:-1]
    n_layers = len(param_refs) // 2

    h = x_ref[...]                                  # bf16 (bt, 128)
    for layer in range(n_layers):
        w = param_refs[2 * layer][...]              # bf16 (128, 128)
        b = param_refs[2 * layer + 1][...]          # f32  (1, 128)
        acc = jnp.dot(h, w, preferred_element_type=jnp.float32) + b
        if layer < n_layers - 1:
            acc = jnp.maximum(acc, NEG_SLOPE * acc)  # LeakyReLU(0.01)
            h = acc.astype(jnp.bfloat16)
        else:
            out_ref[...] = acc.astype(out_ref.dtype)


def prepare_params(params):
    """Pad (W(in,out), b(1,out)) to 128-lane widths; store W as bf16, b as f32."""
    prepped = []
    for w, b in params:
        pin = _round_up(w.shape[0], LANE)
        pout = _round_up(w.shape[1], LANE)
        wp = jnp.zeros((pin, pout), jnp.bfloat16)
        wp = wp.at[: w.shape[0], : w.shape[1]].set(w.astype(jnp.bfloat16))
        bp = jnp.zeros((1, pout), jnp.float32)
        bp = bp.at[:, : b.shape[1]].set(b.astype(jnp.float32))
        prepped.append((wp, bp))
    return prepped


@functools.partial(jax.jit, static_argnames=("out_dim",))
def classify_fc_forward(x, prepped_params, *, out_dim):
    """x: (batch, arch[0]) f32.  prepped_params: list of (W_bf16, b_f32) padded."""
    batch, in_dim = x.shape
    pad_in = prepped_params[0][0].shape[0]
    pad_out = prepped_params[-1][0].shape[1]

    # --- batch tiling: up to 256 rows per grid step, multiple of 8 ---
    bt = 256
    if batch < bt:
        bt = max(SUBLANE, _round_up(batch, SUBLANE))
    padded_batch = _round_up(batch, bt)
    n_tiles = padded_batch // bt

    # --- zero-pad x to (padded_batch, pad_in) and cast to bf16 ---
    x_p = jnp.zeros((padded_batch, pad_in), jnp.bfloat16)
    x_p = x_p.at[:batch, :in_dim].set(x.astype(jnp.bfloat16))

    flat_inputs = [x_p]
    in_specs = [pl.BlockSpec((bt, pad_in), lambda i: (i, 0))]
    for w, b in prepped_params:
        flat_inputs += [w, b]
        # constant index maps -> weights/biases stay VMEM-resident across steps
        in_specs += [pl.BlockSpec(w.shape, lambda i: (0, 0)),
                     pl.BlockSpec(b.shape, lambda i: (0, 0))]

    out_p = pl.pallas_call(
        _mlp_kernel,
        out_shape=jax.ShapeDtypeStruct((padded_batch, pad_out), jnp.float32),
        grid=(n_tiles,),
        in_specs=in_specs,
        out_specs=pl.BlockSpec((bt, pad_out), lambda i: (i, 0)),
        compiler_params=pltpu.CompilerParams(
            dimension_semantics=("parallel",)),
    )(*flat_inputs)

    return out_p[:batch, :out_dim]


def init_params(key, arch):
    """Deterministic PyTorch-style nn.Linear init: U(-1/sqrt(fan_in), +)."""
    params = []
    for i in range(len(arch) - 1):
        fan_in, fan_out = arch[i], arch[i + 1]
        key, kw, kb = jax.random.split(key, 3)
        bound = 1.0 / jnp.sqrt(fan_in)
        # stored pre-transposed: (in, out)
        w = jax.random.uniform(kw, (fan_in, fan_out), jnp.float32, -bound, bound)
        b = jax.random.uniform(kb, (1, fan_out), jnp.float32, -bound, bound)
        params.append((w, b))
    return params


def reference_forward_f32(x, params):
    h = x
    for i, (w, b) in enumerate(params):
        h = h @ w + b
        if i < len(params) - 1:
            h = jnp.where(h > 0, h, NEG_SLOPE * h)
    return h


def reference_forward_bf16(x, params):
    """Mimics the kernel's precision (bf16 operands, f32 accumulation)."""
    h = x.astype(jnp.bfloat16)
    for i, (w, b) in enumerate(params):
        acc = jnp.dot(h, w.astype(jnp.bfloat16),
                      preferred_element_type=jnp.float32) + b
        if i < len(params) - 1:
            acc = jnp.maximum(acc, NEG_SLOPE * acc)
            h = acc.astype(jnp.bfloat16)
        else:
            return acc
    return h


if __name__ == "__main__":
    # arch has 8 entries -> 7 Linear layers, matching the module.
    arch = [32, 64, 48, 64, 32, 64, 48, 16]

    key = jax.random.PRNGKey(0)
    key, kp = jax.random.split(key)
    params = init_params(kp, arch)
    prepped = prepare_params(params)
    out_dim = arch[-1]

    # Small batch (single grid step) and larger batch (multi-step batch grid).
    for batch in (8, 640):
        key, kx = jax.random.split(key)
        x = jax.random.normal(kx, (batch, arch[0]), jnp.float32)

        out = jax.block_until_ready(classify_fc_forward(x, prepped, out_dim=out_dim))
        assert out.shape == (batch, out_dim)

        ref_bf16 = reference_forward_bf16(x, params)   # same precision as kernel
        ref_f32 = reference_forward_f32(x, params)     # full-f32 PyTorch semantics
        assert jnp.allclose(out, ref_bf16, atol=1e-4, rtol=1e-4), \
            "mismatch vs bf16-precision reference"
        assert jnp.allclose(out, ref_f32, atol=5e-2, rtol=5e-2), \
            "mismatch vs f32 reference"

    print("KERNEL_OK")
</pallas_src>

<mosaic_0001>
module attributes {stable_mosaic.version = 11 : i64} {
  func.func @_mlp_kernel(%arg0: i32, %arg1: memref<8x128xbf16, #tpu.memory_space<vmem>>, %arg2: memref<128x128xbf16, #tpu.memory_space<vmem>>, %arg3: memref<1x128xf32, #tpu.memory_space<vmem>>, %arg4: memref<128x128xbf16, #tpu.memory_space<vmem>>, %arg5: memref<1x128xf32, #tpu.memory_space<vmem>>, %arg6: memref<128x128xbf16, #tpu.memory_space<vmem>>, %arg7: memref<1x128xf32, #tpu.memory_space<vmem>>, %arg8: memref<128x128xbf16, #tpu.memory_space<vmem>>, %arg9: memref<1x128xf32, #tpu.memory_space<vmem>>, %arg10: memref<128x128xbf16, #tpu.memory_space<vmem>>, %arg11: memref<1x128xf32, #tpu.memory_space<vmem>>, %arg12: memref<128x128xbf16, #tpu.memory_space<vmem>>, %arg13: memref<1x128xf32, #tpu.memory_space<vmem>>, %arg14: memref<128x128xbf16, #tpu.memory_space<vmem>>, %arg15: memref<1x128xf32, #tpu.memory_space<vmem>>, %arg16: memref<8x128xf32, #tpu.memory_space<vmem>>) attributes {dimension_semantics = [#tpu.dimension_semantics<parallel>], iteration_bounds = array<i64: 1>, scalar_prefetch = 0 : i64, scratch_operands = 0 : i64, tpu.core_type = #tpu.core_type<tc>, window_params = [{transform_indices = @transform_0, window_bounds = array<i64: 8, 128>}, {pipeline_mode = #tpu.pipeline_mode<synchronous>, transform_indices = @transform_1, window_bounds = array<i64: 128, 128>}, {pipeline_mode = #tpu.pipeline_mode<synchronous>, transform_indices = @transform_2, window_bounds = array<i64: 1, 128>}, {pipeline_mode = #tpu.pipeline_mode<synchronous>, transform_indices = @transform_3, window_bounds = array<i64: 128, 128>}, {pipeline_mode = #tpu.pipeline_mode<synchronous>, transform_indices = @transform_4, window_bounds = array<i64: 1, 128>}, {pipeline_mode = #tpu.pipeline_mode<synchronous>, transform_indices = @transform_5, window_bounds = array<i64: 128, 128>}, {pipeline_mode = #tpu.pipeline_mode<synchronous>, transform_indices = @transform_6, window_bounds = array<i64: 1, 128>}, {pipeline_mode = #tpu.pipeline_mode<synchronous>, transform_indices = @transform_7, window_bounds = array<i64: 128, 128>}, {pipeline_mode = #tpu.pipeline_mode<synchronous>, transform_indices = @transform_8, window_bounds = array<i64: 1, 128>}, {pipeline_mode = #tpu.pipeline_mode<synchronous>, transform_indices = @transform_9, window_bounds = array<i64: 128, 128>}, {pipeline_mode = #tpu.pipeline_mode<synchronous>, transform_indices = @transform_10, window_bounds = array<i64: 1, 128>}, {pipeline_mode = #tpu.pipeline_mode<synchronous>, transform_indices = @transform_11, window_bounds = array<i64: 128, 128>}, {pipeline_mode = #tpu.pipeline_mode<synchronous>, transform_indices = @transform_12, window_bounds = array<i64: 1, 128>}, {pipeline_mode = #tpu.pipeline_mode<synchronous>, transform_indices = @transform_13, window_bounds = array<i64: 128, 128>}, {pipeline_mode = #tpu.pipeline_mode<synchronous>, transform_indices = @transform_14, window_bounds = array<i64: 1, 128>}, {transform_indices = @transform_15, window_bounds = array<i64: 8, 128>}]} {
    %c0 = arith.constant 0 : index
    %c0_0 = arith.constant 0 : index
    %0 = vector.load %arg1[%c0, %c0_0] : memref<8x128xbf16, #tpu.memory_space<vmem>>, vector<8x128xbf16>
    %c0_1 = arith.constant 0 : index
    %c0_2 = arith.constant 0 : index
    %1 = vector.load %arg2[%c0_1, %c0_2] : memref<128x128xbf16, #tpu.memory_space<vmem>>, vector<128x128xbf16>
    %c0_3 = arith.constant 0 : index
    %c0_4 = arith.constant 0 : index
    %2 = vector.load %arg3[%c0_3, %c0_4] : memref<1x128xf32, #tpu.memory_space<vmem>>, vector<1x128xf32>
    %cst = arith.constant dense<0.000000e+00> : vector<8x128xf32>
    %3 = tpu.matmul %0, %1, %cst {dimension_numbers = #tpu.dot_dimension_numbers<[1], [0], [0], [1], [0, 0, 1, 1], [], []>} : vector<8x128xbf16>, vector<128x128xbf16>, vector<8x128xf32> -> vector<8x128xf32>
    %4 = vector.broadcast %2 : vector<1x128xf32> to vector<8x128xf32>
    %5 = arith.addf %3, %4 : vector<8x128xf32>
    %cst_5 = arith.constant 0.00999999977 : f32
    %6 = vector.broadcast %cst_5 : f32 to vector<8x128xf32>
    %7 = arith.mulf %6, %5 : vector<8x128xf32>
    %8 = arith.maximumf %5, %7 : vector<8x128xf32>
    %9 = arith.truncf %8 : vector<8x128xf32> to vector<8x128xbf16>
    %c0_6 = arith.constant 0 : index
    %c0_7 = arith.constant 0 : index
    %10 = vector.load %arg4[%c0_6, %c0_7] : memref<128x128xbf16, #tpu.memory_space<vmem>>, vector<128x128xbf16>
    %c0_8 = arith.constant 0 : index
    %c0_9 = arith.constant 0 : index
    %11 = vector.load %arg5[%c0_8, %c0_9] : memref<1x128xf32, #tpu.memory_space<vmem>>, vector<1x128xf32>
    %cst_10 = arith.constant dense<0.000000e+00> : vector<8x128xf32>
    %12 = tpu.matmul %9, %10, %cst_10 {dimension_numbers = #tpu.dot_dimension_numbers<[1], [0], [0], [1], [0, 0, 1, 1], [], []>} : vector<8x128xbf16>, vector<128x128xbf16>, vector<8x128xf32> -> vector<8x128xf32>
    %13 = vector.broadcast %11 : vector<1x128xf32> to vector<8x128xf32>
    %14 = arith.addf %12, %13 : vector<8x128xf32>
    %cst_11 = arith.constant 0.00999999977 : f32
    %15 = vector.broadcast %cst_11 : f32 to vector<8x128xf32>
    %16 = arith.mulf %15, %14 : vector<8x128xf32>
    %17 = arith.maximumf %14, %16 : vector<8x128xf32>
    %18 = arith.truncf %17 : vector<8x128xf32> to vector<8x128xbf16>
    %c0_12 = arith.constant 0 : index
    %c0_13 = arith.constant 0 : index
    %19 = vector.load %arg6[%c0_12, %c0_13] : memref<128x128xbf16, #tpu.memory_space<vmem>>, vector<128x128xbf16>
    %c0_14 = arith.constant 0 : index
    %c0_15 = arith.constant 0 : index
    %20 = vector.load %arg7[%c0_14, %c0_15] : memref<1x128xf32, #tpu.memory_space<vmem>>, vector<1x128xf32>
    %cst_16 = arith.constant dense<0.000000e+00> : vector<8x128xf32>
    %21 = tpu.matmul %18, %19, %cst_16 {dimension_numbers = #tpu.dot_dimension_numbers<[1], [0], [0], [1], [0, 0, 1, 1], [], []>} : vector<8x128xbf16>, vector<128x128xbf16>, vector<8x128xf32> -> vector<8x128xf32>
    %22 = vector.broadcast %20 : vector<1x128xf32> to vector<8x128xf32>
    %23 = arith.addf %21, %22 : vector<8x128xf32>
    %cst_17 = arith.constant 0.00999999977 : f32
    %24 = vector.broadcast %cst_17 : f32 to vector<8x128xf32>
    %25 = arith.mulf %24, %23 : vector<8x128xf32>
    %26 = arith.maximumf %23, %25 : vector<8x128xf32>
    %27 = arith.truncf %26 : vector<8x128xf32> to vector<8x128xbf16>
    %c0_18 = arith.constant 0 : index
    %c0_19 = arith.constant 0 : index
    %28 = vector.load %arg8[%c0_18, %c0_19] : memref<128x128xbf16, #tpu.memory_space<vmem>>, vector<128x128xbf16>
    %c0_20 = arith.constant 0 : index
    %c0_21 = arith.constant 0 : index
    %29 = vector.load %arg9[%c0_20, %c0_21] : memref<1x128xf32, #tpu.memory_space<vmem>>, vector<1x128xf32>
    %cst_22 = arith.constant dense<0.000000e+00> : vector<8x128xf32>
    %30 = tpu.matmul %27, %28, %cst_22 {dimension_numbers = #tpu.dot_dimension_numbers<[1], [0], [0], [1], [0, 0, 1, 1], [], []>} : vector<8x128xbf16>, vector<128x128xbf16>, vector<8x128xf32> -> vector<8x128xf32>
    %31 = vector.broadcast %29 : vector<1x128xf32> to vector<8x128xf32>
    %32 = arith.addf %30, %31 : vector<8x128xf32>
    %cst_23 = arith.constant 0.00999999977 : f32
    %33 = vector.broadcast %cst_23 : f32 to vector<8x128xf32>
    %34 = arith.mulf %33, %32 : vector<8x128xf32>
    %35 = arith.maximumf %32, %34 : vector<8x128xf32>
    %36 = arith.truncf %35 : vector<8x128xf32> to vector<8x128xbf16>
    %c0_24 = arith.constant 0 : index
    %c0_25 = arith.constant 0 : index
    %37 = vector.load %arg10[%c0_24, %c0_25] : memref<128x128xbf16, #tpu.memory_space<vmem>>, vector<128x128xbf16>
    %c0_26 = arith.constant 0 : index
    %c0_27 = arith.constant 0 : index
    %38 = vector.load %arg11[%c0_26, %c0_27] : memref<1x128xf32, #tpu.memory_space<vmem>>, vector<1x128xf32>
    %cst_28 = arith.constant dense<0.000000e+00> : vector<8x128xf32>
    %39 = tpu.matmul %36, %37, %cst_28 {dimension_numbers = #tpu.dot_dimension_numbers<[1], [0], [0], [1], [0, 0, 1, 1], [], []>} : vector<8x128xbf16>, vector<128x128xbf16>, vector<8x128xf32> -> vector<8x128xf32>
    %40 = vector.broadcast %38 : vector<1x128xf32> to vector<8x128xf32>
    %41 = arith.addf %39, %40 : vector<8x128xf32>
    %cst_29 = arith.constant 0.00999999977 : f32
    %42 = vector.broadcast %cst_29 : f32 to vector<8x128xf32>
    %43 = arith.mulf %42, %41 : vector<8x128xf32>
    %44 = arith.maximumf %41, %43 : vector<8x128xf32>
    %45 = arith.truncf %44 : vector<8x128xf32> to vector<8x128xbf16>
    %c0_30 = arith.constant 0 : index
    %c0_31 = arith.constant 0 : index
    %46 = vector.load %arg12[%c0_30, %c0_31] : memref<128x128xbf16, #tpu.memory_space<vmem>>, vector<128x128xbf16>
    %c0_32 = arith.constant 0 : index
    %c0_33 = arith.constant 0 : index
    %47 = vector.load %arg13[%c0_32, %c0_33] : memref<1x128xf32, #tpu.memory_space<vmem>>, vector<1x128xf32>
    %cst_34 = arith.constant dense<0.000000e+00> : vector<8x128xf32>
    %48 = tpu.matmul %45, %46, %cst_34 {dimension_numbers = #tpu.dot_dimension_numbers<[1], [0], [0], [1], [0, 0, 1, 1], [], []>} : vector<8x128xbf16>, vector<128x128xbf16>, vector<8x128xf32> -> vector<8x128xf32>
    %49 = vector.broadcast %47 : vector<1x128xf32> to vector<8x128xf32>
    %50 = arith.addf %48, %49 : vector<8x128xf32>
    %cst_35 = arith.constant 0.00999999977 : f32
    %51 = vector.broadcast %cst_35 : f32 to vector<8x128xf32>
    %52 = arith.mulf %51, %50 : vector<8x128xf32>
    %53 = arith.maximumf %50, %52 : vector<8x128xf32>
    %54 = arith.truncf %53 : vector<8x128xf32> to vector<8x128xbf16>
    %c0_36 = arith.constant 0 : index
    %c0_37 = arith.constant 0 : index
    %55 = vector.load %arg14[%c0_36, %c0_37] : memref<128x128xbf16, #tpu.memory_space<vmem>>, vector<128x128xbf16>
    %c0_38 = arith.constant 0 : index
    %c0_39 = arith.constant 0 : index
    %56 = vector.load %arg15[%c0_38, %c0_39] : memref<1x128xf32, #tpu.memory_space<vmem>>, vector<1x128xf32>
    %cst_40 = arith.constant dense<0.000000e+00> : vector<8x128xf32>
    %57 = tpu.matmul %54, %55, %cst_40 {dimension_numbers = #tpu.dot_dimension_numbers<[1], [0], [0], [1], [0, 0, 1, 1], [], []>} : vector<8x128xbf16>, vector<128x128xbf16>, vector<8x128xf32> -> vector<8x128xf32>
    %58 = vector.broadcast %56 : vector<1x128xf32> to vector<8x128xf32>
    %59 = arith.addf %57, %58 : vector<8x128xf32>
    %c0_41 = arith.constant 0 : index
    %c0_42 = arith.constant 0 : index
    %60 = vector.load %arg16[%c0_41, %c0_42] : memref<8x128xf32, #tpu.memory_space<vmem>>, vector<8x128xf32>
    tpu.vector_store %arg16[%c0_41, %c0_42], %59 {strides = array<i32>} : memref<8x128xf32, #tpu.memory_space<vmem>>, vector<8x128xf32>,
    return
  }
  func.func @transform_0(%arg0: i32) -> (i32, i32) {
    %c0_i32 = arith.constant 0 : i32
    %c0_i32_0 = arith.constant 0 : i32
    return %arg0, %c0_i32 : i32, i32
  }
  func.func @transform_1(%arg0: i32) -> (i32, i32) {
    %c0_i32 = arith.constant 0 : i32
    %c0_i32_0 = arith.constant 0 : i32
    %c0_i32_1 = arith.constant 0 : i32
    return %c0_i32, %c0_i32_0 : i32, i32
  }
  func.func @transform_2(%arg0: i32) -> (i32, i32) {
    %c0_i32 = arith.constant 0 : i32
    %c0_i32_0 = arith.constant 0 : i32
    %c0_i32_1 = arith.constant 0 : i32
    return %c0_i32, %c0_i32_0 : i32, i32
  }
  func.func @transform_3(%arg0: i32) -> (i32, i32) {
    %c0_i32 = arith.constant 0 : i32
    %c0_i32_0 = arith.constant 0 : i32
    %c0_i32_1 = arith.constant 0 : i32
    return %c0_i32, %c0_i32_0 : i32, i32
  }
  func.func @transform_4(%arg0: i32) -> (i32, i32) {
    %c0_i32 = arith.constant 0 : i32
    %c0_i32_0 = arith.constant 0 : i32
    %c0_i32_1 = arith.constant 0 : i32
    return %c0_i32, %c0_i32_0 : i32, i32
  }
  func.func @transform_5(%arg0: i32) -> (i32, i32) {
    %c0_i32 = arith.constant 0 : i32
    %c0_i32_0 = arith.constant 0 : i32
    %c0_i32_1 = arith.constant 0 : i32
    return %c0_i32, %c0_i32_0 : i32, i32
  }
  func.func @transform_6(%arg0: i32) -> (i32, i32) {
    %c0_i32 = arith.constant 0 : i32
    %c0_i32_0 = arith.constant 0 : i32
    %c0_i32_1 = arith.constant 0 : i32
    return %c0_i32, %c0_i32_0 : i32, i32
  }
  func.func @transform_7(%arg0: i32) -> (i32, i32) {
    %c0_i32 = arith.constant 0 : i32
    %c0_i32_0 = arith.constant 0 : i32
    %c0_i32_1 = arith.constant 0 : i32
    return %c0_i32, %c0_i32_0 : i32, i32
  }
  func.func @transform_8(%arg0: i32) -> (i32, i32) {
    %c0_i32 = arith.constant 0 : i32
    %c0_i32_0 = arith.constant 0 : i32
    %c0_i32_1 = arith.constant 0 : i32
    return %c0_i32, %c0_i32_0 : i32, i32
  }
  func.func @transform_9(%arg0: i32) -> (i32, i32) {
    %c0_i32 = arith.constant 0 : i32
    %c0_i32_0 = arith.constant 0 : i32
    %c0_i32_1 = arith.constant 0 : i32
    return %c0_i32, %c0_i32_0 : i32, i32
  }
  func.func @transform_10(%arg0: i32) -> (i32, i32) {
    %c0_i32 = arith.constant 0 : i32
    %c0_i32_0 = arith.constant 0 : i32
    %c0_i32_1 = arith.constant 0 : i32
    return %c0_i32, %c0_i32_0 : i32, i32
  }
  func.func @transform_11(%arg0: i32) -> (i32, i32) {
    %c0_i32 = arith.constant 0 : i32
    %c0_i32_0 = arith.constant 0 : i32
    %c0_i32_1 = arith.constant 0 : i32
    return %c0_i32, %c0_i32_0 : i32, i32
  }
  func.func @transform_12(%arg0: i32) -> (i32, i32) {
    %c0_i32 = arith.constant 0 : i32
    %c0_i32_0 = arith.constant 0 : i32
    %c0_i32_1 = arith.constant 0 : i32
    return %c0_i32, %c0_i32_0 : i32, i32
  }
  func.func @transform_13(%arg0: i32) -> (i32, i32) {
    %c0_i32 = arith.constant 0 : i32
    %c0_i32_0 = arith.constant 0 : i32
    %c0_i32_1 = arith.constant 0 : i32
    return %c0_i32, %c0_i32_0 : i32, i32
  }
  func.func @transform_14(%arg0: i32) -> (i32, i32) {
    %c0_i32 = arith.constant 0 : i32
    %c0_i32_0 = arith.constant 0 : i32
    %c0_i32_1 = arith.constant 0 : i32
    return %c0_i32, %c0_i32_0 : i32, i32
  }
  func.func @transform_15(%arg0: i32) -> (i32, i32) {
    %c0_i32 = arith.constant 0 : i32
    %c0_i32_0 = arith.constant 0 : i32
    return %arg0, %c0_i32 : i32, i32
  }
}

</mosaic_0001>

<bundles_post_ra>
// kernel: classify_fc_forward.1
= control target key start
LH: loop header
LB: loop body
LE: loop exit
PB: predicated region body
PF: predicated region fallthrough
CT: control target
= control target key end

     0   :  { %20 = vsyncpa [#allocation3], 0  ;;  %s1870_s0 = inlined_call_operand.vmem [shape: bf16[8,128], index: 0, kind: input, shape index: {}]   ;;  %s1871_s1 = inlined_call_operand.hbm [shape: bf16[128,128], index: 1, kind: input, shape index: {}]   ;;  %s1872_s2 = inlined_call_operand.vmem [shape: f32[1,128], index: 2, kind: input, shape index: {}]   ;;  %s1873_s3 = inlined_call_operand.hbm [shape: bf16[128,128], index: 3, kind: input, shape index: {}]   ;;  %s1874_s4 = inlined_call_operand.vmem [shape: f32[1,128], index: 4, kind: input, shape index: {}]   ;;  %s1875_s5 = inlined_call_operand.hbm [shape: bf16[128,128], index: 5, kind: input, shape index: {}]   ;;  %s1876_s6 = inlined_call_operand.vmem [shape: f32[1,128], index: 6, kind: input, shape index: {}]   ;;  %s1877_s7 = inlined_call_operand.hbm [shape: bf16[128,128], index: 7, kind: input, shape index: {}]   ;;  %s1878_s8 = inlined_call_operand.hbm [shape: f32[1,128], index: 8, kind: input, shape index: {}]   ;;  %s1879_s9 = inlined_call_operand.hbm [shape: bf16[128,128], index: 9, kind: input, shape index: {}]   ;;  %s1880_s10 = inlined_call_operand.hbm [shape: f32[1,128], index: 10, kind: input, shape index: {}]   ;;  %s1881_s11 = inlined_call_operand.vmem [shape: bf16[128,128], index: 11, kind: input, shape index: {}]   ;;  %s1882_s12 = inlined_call_operand.vmem [shape: f32[1,128], index: 12, kind: input, shape index: {}]   ;;  %s1883_s13 = inlined_call_operand.hbm [shape: bf16[128,128], index: 13, kind: input, shape index: {}]   ;;  %s1884_s14 = inlined_call_operand.vmem [shape: f32[1,128], index: 14, kind: input, shape index: {}]   ;;  %s1885_s15 = inlined_call_operand.hbm [shape: f32[8,128], index: 15, kind: output, shape index: {}]  }
   0x1   :  { %21 = vsyncpa [#allocation6], 0 }
   0x2   :  { %22 = vsyncpa [#allocation9], 0 }
   0x3   :  { %23 = vsyncpa [#allocation12], 0 }
   0x4   :  { %24 = vsyncpa [#allocation15], 0 }
   0x5   :  { %25 = vsyncpa [#allocation4], 0  ;;  %s1518_s18 = smov [#allocation5]   ;;  %s1519_s20 = smov [#allocation8]  }
   0x6   :  { %s47_s19 = sshll.u32 %s1518_s18, 4  ;;  %s75_s21 = sshll.u32 %s1519_s20, 4  ;;  %s48_s19 = int_to_ptr.vmem [resolvable:$true] %s47_s19  ;;  %s1611_s21 = int_to_ptr.vmem [resolvable:$true] %s75_s21 }
   0x7   :  { %s1308_s24 = scalar_lea.hbm %s1873_s3, 1024 }
   0x8   :  { %p1309_p0 = scmp.ne.s32.totalorder %s1873_s3, %s1308_s24  ;;  %p1312_p1 = scmp.lt.u32.totalorder %s1308_s24, %s1873_s3 }
   0xa   :  { %p1314_p2 = pnand %p1312_p1, %p1309_p0 }
   0xc   :  { %1317 = shalt.err (!%p1314_p2)
}
   0xd   :  { %s1318_s29 = scalar_lea.vmem %s48_s19, 1024  ;;  %p1323_p4 = scmp.lt.s32.totalorder %s48_s19, %s48_s19 }
   0xe   :  { %p1319_p3 = scmp.ne.s32.totalorder %s48_s19, %s1318_s29  ;;  %p1324_p5 = scmp.lt.s32.totalorder %s1318_s29, %s1318_s29 }
  0x10   :  { %p1325_p6 = por %p1324_p5, %p1323_p4 }
  0x12   :  { %p1326_p7 = pnand %p1325_p6, %p1319_p3 }
  0x14   :  { %1329 = shalt.err (!%p1326_p7)
}
  0x15   :  { %s1520_s30 = smov 64   ;;  %s1521_s16 = smov 4  }
  0x16   :  { %53 = dma.hbm_to_vmem [thread:$0]  %s1873_s3, 1024, %s48_s19, [#allocation6], %s1520_s30, %s1520_s30, %s1521_s16  }
  0x17   :  { %s1330_s23 = scalar_lea.hbm %s1877_s7, 1024 }
  0x18   :  { %p1331_p8 = scmp.ne.s32.totalorder %s1877_s7, %s1330_s23  ;;  %p1334_p9 = scmp.lt.u32.totalorder %s1330_s23, %s1877_s7 }
  0x1a   :  { %p1336_p10 = pnand %p1334_p9, %p1331_p8 }
  0x1c   :  { %1339 = shalt.err (!%p1336_p10)
}
  0x1d   :  { %s1340_s28 = scalar_lea.vmem %s1611_s21, 1024  ;;  %p1345_p12 = scmp.lt.s32.totalorder %s1611_s21, %s1611_s21 }
  0x1e   :  { %p1341_p11 = scmp.ne.s32.totalorder %s1611_s21, %s1340_s28  ;;  %p1346_p13 = scmp.lt.s32.totalorder %s1340_s28, %s1340_s28 }
  0x20   :  { %p1347_p0 = por %p1346_p13, %p1345_p12 }
  0x22   :  { %p1348_p1 = pnand %p1347_p0, %p1341_p11 }
  0x24   :  { %1351 = shalt.err (!%p1348_p1)
}
  0x25   :  { %81 = dma.hbm_to_vmem [thread:$0]  %s1877_s7, 1024, %s1611_s21, [#allocation9], %s1520_s30, %s1520_s30, %s1521_s16  }
  0x26   :  { %s1522_s29 = smov [#allocation11]   ;;  %s1523_s18 = smov [#allocation2]  }
  0x27   :  { %s97_s17 = sshll.u32 %s1522_s29, 4  ;;  %s33_s20 = sshll.u32 %s1523_s18, 4  ;;  %s98_s17 = int_to_ptr.vmem [resolvable:$true] %s97_s17  ;;  %s1648_s20 = int_to_ptr.vmem [resolvable:$true] %s33_s20 }
  0x28   :  { %s1352_s24 = scalar_lea.hbm %s1879_s9, 1024 }
  0x29   :  { %p1353_p2 = scmp.ne.s32.totalorder %s1879_s9, %s1352_s24  ;;  %p1356_p3 = scmp.lt.u32.totalorder %s1352_s24, %s1879_s9 }
  0x2b   :  { %p1358_p4 = pnand %p1356_p3, %p1353_p2 }
  0x2d   :  { %1361 = shalt.err (!%p1358_p4)
}
  0x2e   :  { %s1362_s7 = scalar_lea.vmem %s98_s17, 1024  ;;  %p1367_p6 = scmp.lt.s32.totalorder %s98_s17, %s98_s17 }
  0x2f   :  { %p1363_p5 = scmp.ne.s32.totalorder %s98_s17, %s1362_s7  ;;  %p1368_p7 = scmp.lt.s32.totalorder %s1362_s7, %s1362_s7 }
  0x31   :  { %p1369_p8 = por %p1368_p7, %p1367_p6 }
  0x33   :  { %p1370_p9 = pnand %p1369_p8, %p1363_p5 }
  0x35   :  { %1373 = shalt.err (!%p1370_p9)
}
  0x36   :  { %103 = dma.hbm_to_vmem [thread:$0]  %s1879_s9, 1024, %s98_s17, [#allocation12], %s1520_s30, %s1520_s30, %s1521_s16  }
  0x37   :  { %s1374_s18 = scalar_lea.hbm %s1871_s1, 1024 }
  0x38   :  { %p1375_p10 = scmp.ne.s32.totalorder %s1871_s1, %s1374_s18  ;;  %p1378_p11 = scmp.lt.u32.totalorder %s1374_s18, %s1871_s1 }
  0x3a   :  { %p1380_p12 = pnand %p1378_p11, %p1375_p10 }
  0x3c   :  { %1383 = shalt.err (!%p1380_p12)
}
  0x3d   :  { %s1384_s26 = scalar_lea.vmem %s1648_s20, 1024  ;;  %p1389_p0 = scmp.lt.s32.totalorder %s1648_s20, %s1648_s20 }
  0x3e   :  { %p1385_p13 = scmp.ne.s32.totalorder %s1648_s20, %s1384_s26  ;;  %p1390_p1 = scmp.lt.s32.totalorder %s1384_s26, %s1384_s26 }
  0x40   :  { %p1391_p2 = por %p1390_p1, %p1389_p0 }
  0x42   :  { %p1392_p3 = pnand %p1391_p2, %p1385_p13 }
  0x44   :  { %1395 = shalt.err (!%p1392_p3)
}
  0x45   :  { %39 = dma.hbm_to_vmem [thread:$0]  %s1871_s1, 1024, %s1648_s20, [#allocation3], %s1520_s30, %s1520_s30, %s1521_s16  }
  0x46   :  { %s1524_s27 = smov [#allocation7]   ;;  %s1525_s7 = smov [#allocation10]  }
  0x47   :  { %s61_s28 = sshll.u32 %s1524_s27, 4  ;;  %s88_s21 = sshll.u32 %s1525_s7, 4  ;;  %s62_s28 = int_to_ptr.vmem [resolvable:$true] %s61_s28  ;;  %s89_s21 = int_to_ptr.vmem [resolvable:$true] %s88_s21 }
  0x48   :  { %s1396_s29 = scalar_lea.hbm %s1875_s5, 1024 }
  0x49   :  { %p1397_p4 = scmp.ne.s32.totalorder %s1875_s5, %s1396_s29  ;;  %p1400_p5 = scmp.lt.u32.totalorder %s1396_s29, %s1875_s5 }
  0x4b   :  { %p1402_p6 = pnand %p1400_p5, %p1397_p4 }
  0x4d   :  { %1405 = shalt.err (!%p1402_p6)
}
  0x4e   :  { %s1406_s1 = scalar_lea.vmem %s62_s28, 1024  ;;  %p1411_p8 = scmp.lt.s32.totalorder %s62_s28, %s62_s28 }
  0x4f   :  { %p1407_p7 = scmp.ne.s32.totalorder %s62_s28, %s1406_s1  ;;  %p1412_p9 = scmp.lt.s32.totalorder %s1406_s1, %s1406_s1 }
  0x51   :  { %p1413_p10 = por %p1412_p9, %p1411_p8 }
  0x53   :  { %p1414_p11 = pnand %p1413_p10, %p1407_p7 }
  0x55   :  { %1417 = shalt.err (!%p1414_p11)
}
  0x56   :  { %67 = dma.hbm_to_vmem [thread:$0]  %s1875_s5, 1024, %s62_s28, [#allocation6], %s1520_s30, %s1520_s30, %s1521_s16  }
  0x57   :  { %s1418_s17 = scalar_lea.hbm %s1878_s8, 16 }
  0x58   :  { %p1419_p12 = scmp.ne.s32.totalorder %s1878_s8, %s1418_s17  ;;  %p1422_p13 = scmp.lt.u32.totalorder %s1418_s17, %s1878_s8 }
  0x5a   :  { %p1424_p0 = pnand %p1422_p13, %p1419_p12 }
  0x5c   :  { %1427 = shalt.err (!%p1424_p0)
}
  0x5d   :  { %s1428_s29 = scalar_lea.vmem %s89_s21, 16  ;;  %s1432_s18 = scalar_lea.vmem %s89_s21, 32 }
  0x5e   :  { %p1429_p1 = scmp.ne.s32.totalorder %s89_s21, %s1428_s29  ;;  %p1433_p2 = scmp.lt.s32.totalorder %s89_s21, %s89_s21 }
  0x5f   :  { %p1434_p3 = scmp.lt.s32.totalorder %s1432_s18, %s1428_s29 }
  0x61   :  { %p1435_p4 = por %p1434_p3, %p1433_p2 }
  0x63   :  { %p1436_p5 = pnand %p1435_p4, %p1429_p1 }
  0x65   :  { %1439 = shalt.err (!%p1436_p5)
}
  0x66   :  { %91 = dma.hbm_to_vmem [thread:$0]  %s1878_s8, 16, %s89_s21, [#allocation9]  }
  0x67   :  { %s1526_s22 = smov [#allocation13]   ;;  %s1527_s24 = smov [#allocation14]  }
  0x68   :  { %s110_s23 = sshll.u32 %s1526_s22, 4  ;;  %s123_s1 = sshll.u32 %s1527_s24, 4  ;;  %s111_s23 = int_to_ptr.vmem [resolvable:$true] %s110_s23  ;;  %s1712_s1 = int_to_ptr.vmem [resolvable:$true] %s123_s1 }
  0x69   :  { %s1440_s26 = scalar_lea.hbm %s1880_s10, 16 }
  0x6a   :  { %p1441_p6 = scmp.ne.s32.totalorder %s1880_s10, %s1440_s26  ;;  %p1444_p7 = scmp.lt.u32.totalorder %s1440_s26, %s1880_s10 }
  0x6c   :  { %p1446_p8 = pnand %p1444_p7, %p1441_p6 }
  0x6e   :  { %1449 = shalt.err (!%p1446_p8)
}
  0x6f   :  { %s1450_s8 = scalar_lea.vmem %s111_s23, 16  ;;  %s1454_s21 = scalar_lea.vmem %s111_s23, 32 }
  0x70   :  { %p1451_p9 = scmp.ne.s32.totalorder %s111_s23, %s1450_s8  ;;  %p1455_p10 = scmp.lt.s32.totalorder %s111_s23, %s111_s23 }
  0x71   :  { %p1456_p11 = scmp.lt.s32.totalorder %s1454_s21, %s1450_s8 }
  0x73   :  { %p1457_p12 = por %p1456_p11, %p1455_p10 }
  0x75   :  { %p1458_p13 = pnand %p1457_p12, %p1451_p9 }
  0x77   :  { %1461 = shalt.err (!%p1458_p13)
}
  0x78   :  { %113 = dma.hbm_to_vmem [thread:$0]  %s1880_s10, 16, %s111_s23, [#allocation12]  }
  0x79   :  { %s1462_s5 = scalar_lea.hbm %s1883_s13, 1024 }
  0x7a   :  { %p1463_p0 = scmp.ne.s32.totalorder %s1883_s13, %s1462_s5  ;;  %p1466_p1 = scmp.lt.u32.totalorder %s1462_s5, %s1883_s13 }
  0x7c   :  { %p1468_p2 = pnand %p1466_p1, %p1463_p0 }
  0x7e   :  { %1471 = shalt.err (!%p1468_p2)
}
  0x7f   :  { %s1472_s25 = scalar_lea.vmem %s1712_s1, 1024  ;;  %p1477_p4 = scmp.lt.s32.totalorder %s1712_s1, %s1712_s1 }
  0x80   :  { %p1473_p3 = scmp.ne.s32.totalorder %s1712_s1, %s1472_s25  ;;  %p1478_p5 = scmp.lt.s32.totalorder %s1472_s25, %s1472_s25 }
  0x82   :  { %p1479_p6 = por %p1478_p5, %p1477_p4 }
  0x84   :  { %p1480_p7 = pnand %p1479_p6, %p1473_p3 }
  0x86   :  { %1483 = shalt.err (!%p1480_p7)
}
  0x87   :  { %129 = dma.hbm_to_vmem [thread:$0]  %s1883_s13, 1024, %s1712_s1, [#allocation15], %s1520_s30, %s1520_s30, %s1521_s16  }
  0x88   :  { %1506 = dma.done.wait [#allocation3], 1024  }
  0x89   :  { %1507 = vsyncadd [#allocation3], 4294966272 }
  0x8a   :  { %1508 = dma.done.wait [#allocation6], 2048  }
  0x8b   :  { %1509 = vsyncadd [#allocation6], 4294965248 }
  0x8c   :  { %1510 = dma.done.wait [#allocation9], 1040  }
  0x8d   :  { %1511 = vsyncadd [#allocation9], 4294966256 }
  0x8e   :  { %1512 = dma.done.wait [#allocation12], 1040  }
  0x8f   :  { %1513 = vsyncadd [#allocation12], 4294966256 }
  0x90   :  { %1514 = dma.done.wait [#allocation15], 1024  }
  0x91   :  { %1515 = vsyncadd [#allocation15], 4294966272  ;;  %v1528_v0 = vmov 0.0   ;;  %vm1529_vm0 = vmmov 0   ;;  %v1252_v1 = vld [vmem:[#allocation2] sm:$0xff]   ;;  %v1253_v2 = vld [vmem:[#allocation2 + $0x8] sm:$0xff]  }
  0x92   :  { %1099 = vmatprep.subr.bf16.mxu0 %v1528_v0  ;;  %1115 = vmatprep.mubr.msk.bf16.mxu0 %vm1529_vm0, %v1528_v0  ;;  %v1254_v3 = vld [vmem:[#allocation2 + $0x10] sm:$0xff]   ;;  %v1260_v4 = vld [vmem:[#allocation5] sm:$0xff]   ;;  %v1255_v5 = vld [vmem:[#allocation2 + $0x18] sm:$0xff]   ;;  %s1530_s13 = smov [#allocation16]  }
  0x93   :  { %1119 = vmatprep.subr.bf16.mxu1 %v1528_v0  ;;  %1135 = vmatprep.mubr.msk.bf16.mxu1 %vm1529_vm0, %v1528_v0  ;;  %v1261_v6 = vld [vmem:[#allocation5 + $0x8] sm:$0xff]   ;;  %v1256_v7 = vld [vmem:[#allocation2 + $0x20] sm:$0xff]   ;;  %v1262_v8 = vld [vmem:[#allocation5 + $0x10] sm:$0xff]   ;;  %s960_s30 = sshll.u32 %s1530_s13, 4  ;;  %s961_s30 = int_to_ptr.vmem [resolvable:$true] %s960_s30 }
  0x94   :  { %1100 = vmatpush3.bf16.msra.mxu0 %v1252_v1  ;;  %1120 = vmatpush3.bf16.msra.mxu1 %v1260_v4  ;;  %v1257_v9 = vld [vmem:[#allocation2 + $0x28] sm:$0xff]   ;;  %v1263_v10 = vld [vmem:[#allocation5 + $0x18] sm:$0xff]   ;;  %v1258_v11 = vld [vmem:[#allocation2 + $0x30] sm:$0xff]   ;;  %p1489_p9 = scmp.lt.s32.totalorder %s961_s30, %s961_s30 }
  0x95   :  { %1101 = vmatprep.subr.bf16.mxu0 %v1528_v0  ;;  %1121 = vmatprep.subr.bf16.mxu1 %v1528_v0  ;;  %v1264_v12 = vld [vmem:[#allocation5 + $0x20] sm:$0xff]   ;;  %v1259_v13 = vld [vmem:[#allocation2 + $0x38] sm:$0xff]   ;;  %v1265_v14 = vld [vmem:[#allocation5 + $0x28] sm:$0xff]  }
  0x96   :  { %v157_v15 = vld [vmem:[%s1870_s0] sm:$0xf]  ;;  %v1266_v16 = vld [vmem:[#allocation5 + $0x30] sm:$0xff]   ;;  %v1267_v17 = vld [vmem:[#allocation5 + $0x38] sm:$0xff]  }
  0x97   :  { %v1268_v18 = vld [vmem:[#allocation7] sm:$0xff]   ;;  %v1269_v19 = vld [vmem:[#allocation7 + $0x8] sm:$0xff]   ;;  %v1270_v20 = vld [vmem:[#allocation7 + $0x10] sm:$0xff]  }
  0x98   :  { %1102 = vmatpush3.bf16.msra.mxu0 %v1253_v2  ;;  %1122 = vmatpush3.bf16.msra.mxu1 %v1261_v6  ;;  %v1271_v21 = vld [vmem:[#allocation7 + $0x18] sm:$0xff]   ;;  %v1272_v22 = vld [vmem:[#allocation7 + $0x20] sm:$0xff]   ;;  %v1273_v23 = vld [vmem:[#allocation7 + $0x28] sm:$0xff]  }
  0x99   :  { %1103 = vmatprep.subr.bf16.mxu0 %v1528_v0  ;;  %1123 = vmatprep.subr.bf16.mxu1 %v1528_v0  ;;  %v973_v24 = vld [vmem:[%s1872_s2] ss:$0 sm:$0xff]  ;;  %v1274_v33 = vld [vmem:[#allocation7 + $0x30] sm:$0xff]   ;;  %v1275_v34 = vld [vmem:[#allocation7 + $0x38] sm:$0xff]  }
  0x9a   :  { %v1276_v35 = vld [vmem:[#allocation8] sm:$0xff]   ;;  %v1277_v36 = vld [vmem:[#allocation8 + $0x8] sm:$0xff]   ;;  %v1278_v37 = vld [vmem:[#allocation8 + $0x10] sm:$0xff]  }
  0x9b   :  { %v1279_v38 = vld [vmem:[#allocation8 + $0x18] sm:$0xff]   ;;  %v1280_v39 = vld [vmem:[#allocation8 + $0x20] sm:$0xff]   ;;  %v1281_v40 = vld [vmem:[#allocation8 + $0x28] sm:$0xff]  }
  0x9c   :  { %1104 = vmatpush3.bf16.msra.mxu0 %v1254_v3  ;;  %1124 = vmatpush3.bf16.msra.mxu1 %v1262_v8  ;;  %v982_v41 = vld [vmem:[%s1874_s4] ss:$0 sm:$0xff]  ;;  %v1282_v50 = vld [vmem:[#allocation8 + $0x30] sm:$0xff]   ;;  %v1283_v51 = vld [vmem:[#allocation8 + $0x38] sm:$0xff]  }
  0x9d   :  { %1105 = vmatprep.subr.bf16.mxu0 %v1528_v0  ;;  %1125 = vmatprep.subr.bf16.mxu1 %v1528_v0  ;;  %v1284_v52 = vld [vmem:[#allocation11] sm:$0xff]   ;;  %v1285_v53 = vld [vmem:[#allocation11 + $0x8] sm:$0xff]   ;;  %v1286_v54 = vld [vmem:[#allocation11 + $0x10] sm:$0xff]  }
  0x9e   :  { %v1287_v55 = vld [vmem:[#allocation11 + $0x18] sm:$0xff]   ;;  %v1288_v56 = vld [vmem:[#allocation11 + $0x20] sm:$0xff]   ;;  %v1289_v57 = vld [vmem:[#allocation11 + $0x28] sm:$0xff]  }
  0x9f   :  { %v991_v58 = vld [vmem:[%s1876_s6] ss:$0 sm:$0xff]  ;;  %v1290_v4 = vld [vmem:[#allocation11 + $0x30] sm:$0xff]  }
  0xa0   :  { %1106 = vmatpush3.bf16.msra.mxu0 %v1255_v5  ;;  %1126 = vmatpush3.bf16.msra.mxu1 %v1263_v10  ;;  %v1291_v5 = vld [vmem:[#allocation11 + $0x38] sm:$0xff]   ;;  %v1294_v8 = vld [vmem:[%s1881_s11 + $0x10] sm:$0xff]  }
  0xa1   :  { %1107 = vmatprep.subr.bf16.mxu0 %v1528_v0  ;;  %1127 = vmatprep.subr.bf16.mxu1 %v1528_v0  ;;  %v1292_v6 = vld [vmem:[%s1881_s11] sm:$0xff]  }
  0xa2   :  { %v1296_v10 = vld [vmem:[%s1881_s11 + $0x20] sm:$0xff]  }
  0xa4   :  { %1108 = vmatpush3.bf16.msra.mxu0 %v1256_v7  ;;  %1128 = vmatpush3.bf16.msra.mxu1 %v1264_v12  ;;  %v1293_v7 = vld [vmem:[%s1881_s11 + $0x8] sm:$0xff]   ;;  %v1000_v12 = vld [vmem:[#allocation10] ss:$0 sm:$0xff] }
  0xa5   :  { %1109 = vmatprep.subr.bf16.mxu0 %v1528_v0  ;;  %1129 = vmatprep.subr.bf16.mxu1 %v1528_v0 }
  0xa8   :  { %1110 = vmatpush3.bf16.msra.mxu0 %v1257_v9  ;;  %1130 = vmatpush3.bf16.msra.mxu1 %v1265_v14  ;;  %v1295_v9 = vld [vmem:[%s1881_s11 + $0x18] sm:$0xff]  }
  0xa9   :  { %1111 = vmatprep.subr.bf16.mxu0 %v1528_v0  ;;  %1131 = vmatprep.subr.bf16.mxu1 %v1528_v0 }
  0xac   :  { %1112 = vmatpush3.bf16.msra.mxu0 %v1258_v11  ;;  %1132 = vmatpush3.bf16.msra.mxu1 %v1266_v16  ;;  %v1297_v11 = vld [vmem:[%s1881_s11 + $0x28] sm:$0xff]  }
  0xad   :  { %1113 = vmatprep.subr.bf16.mxu0 %v1528_v0  ;;  %1133 = vmatprep.subr.bf16.mxu1 %v1528_v0 }
  0xb0   :  { %1114 = vmatpush3.bf16.msra.mxu0 %v1259_v13  ;;  %1134 = vmatpush3.bf16.msra.mxu1 %v1267_v17 }
  0xb1   :  { %1139 = vmatprep.subr.bf16.mxu0 %v1528_v0  ;;  %1159 = vmatprep.subr.bf16.mxu1 %v1528_v0 }
  0xb3   :  { %1116 = vmatmul.mubr.bf16.vlgmr.msra.gmra.mrb[0].mxu0 %v157_v15 }
  0xb4   :  { %1155 = vmatprep.mubr.msk.bf16.mxu0 %vm1529_vm0, %v1528_v0  ;;  %1140 = vmatpush3.bf16.msra.mxu0 %v1268_v18 }
  0xb5   :  { %1141 = vmatprep.subr.bf16.mxu0 %v1528_v0 }
  0xb8   :  { %1142 = vmatpush3.bf16.msra.mxu0 %v1269_v19 }
  0xb9   :  { %1143 = vmatprep.subr.bf16.mxu0 %v1528_v0 }
  0xbc   :  { %1144 = vmatpush3.bf16.msra.mxu0 %v1270_v20 }
  0xbd   :  { %1145 = vmatprep.subr.bf16.mxu0 %v1528_v0 }
  0xc0   :  { %1146 = vmatpush3.bf16.msra.mxu0 %v1271_v21  ;;  %v1298_v21 = vld [vmem:[%s1881_s11 + $0x30] sm:$0xff]  }
  0xc1   :  { %1147 = vmatprep.subr.bf16.mxu0 %v1528_v0 }
  0xc4   :  { %1148 = vmatpush3.bf16.msra.mxu0 %v1272_v22  ;;  %v1299_v22 = vld [vmem:[%s1881_s11 + $0x38] sm:$0xff]  }
  0xc5   :  { %1149 = vmatprep.subr.bf16.mxu0 %v1528_v0 }
  0xc8   :  { %1150 = vmatpush3.bf16.msra.mxu0 %v1273_v23  ;;  %v1300_v23 = vld [vmem:[#allocation14] sm:$0xff]  }
  0xc9   :  { %1151 = vmatprep.subr.bf16.mxu0 %v1528_v0 }
  0xcc   :  { %1152 = vmatpush3.bf16.msra.mxu0 %v1274_v33 }
  0xcd   :  { %1153 = vmatprep.subr.bf16.mxu0 %v1528_v0 }
  0xd0   :  { %1154 = vmatpush3.bf16.msra.mxu0 %v1275_v34 }
  0xd1   :  { %1179 = vmatprep.subr.bf16.mxu0 %v1528_v0 }
 0x186   :  { %v263_v25 = vpop.f32.mrb[0].mxu0 }
 0x187   :  { %v264_v26 = vadd.f32 %v973_v24, %v263_v25  ;;  %v1117_v27 = vpop.f32.mrb[1].mxu0  ;;  %v1301_v24 = vld [vmem:[#allocation14 + $0x8] sm:$0xff]   ;;  %v1302_v25 = vld [vmem:[#allocation14 + $0x10] sm:$0xff]  }
 0x188   :  { %v266_v28 = vpop.f32.mrb[2].mxu0  ;;  %v1304_v27 = vld [vmem:[#allocation14 + $0x20] sm:$0xff]  }
 0x189   :  { %v269_v29 = vmul.f32 0.01, %v264_v26  ;;  %v1118_v30 = vpop.f32.mrb[3].mxu0  ;;  %v1305_v28 = vld [vmem:[#allocation14 + $0x28] sm:$0xff]  }
 0x18b   :  { %v270_v31 = vmax.f32 %v264_v26, %v269_v29  ;;  %v1303_v26 = vld [vmem:[#allocation14 + $0x18] sm:$0xff]  }
 0x18c   :  { %v1009_v29 = vld [vmem:[#allocation13] ss:$0 sm:$0xff] }
 0x18d   :  { %v271_v32 = vpack.c.bf16 %v270_v31, %v270_v31 }
 0x18f   :  { %1136 = vmatmul.mubr.bf16.vlgmr.msra.gmra.mrb[0].mxu1 %v271_v32 }
 0x190   :  { %1175 = vmatprep.mubr.msk.bf16.mxu1 %vm1529_vm0, %v1528_v0  ;;  %1160 = vmatpush3.bf16.msra.mxu1 %v1276_v35 }
 0x191   :  { %1161 = vmatprep.subr.bf16.mxu1 %v1528_v0 }
 0x194   :  { %1162 = vmatpush3.bf16.msra.mxu1 %v1277_v36 }
 0x195   :  { %1163 = vmatprep.subr.bf16.mxu1 %v1528_v0 }
 0x198   :  { %1164 = vmatpush3.bf16.msra.mxu1 %v1278_v37 }
 0x199   :  { %1165 = vmatprep.subr.bf16.mxu1 %v1528_v0 }
 0x19c   :  { %1166 = vmatpush3.bf16.msra.mxu1 %v1279_v38  ;;  %v1306_v38 = vld [vmem:[#allocation14 + $0x30] sm:$0xff]  }
 0x19d   :  { %1167 = vmatprep.subr.bf16.mxu1 %v1528_v0 }
 0x1a0   :  { %1168 = vmatpush3.bf16.msra.mxu1 %v1280_v39  ;;  %v1307_v39 = vld [vmem:[#allocation14 + $0x38] sm:$0xff]  }
 0x1a1   :  { %1169 = vmatprep.subr.bf16.mxu1 %v1528_v0 }
 0x1a4   :  { %1170 = vmatpush3.bf16.msra.mxu1 %v1281_v40  ;;  %v1018_v40 = vld [vmem:[%s1882_s12] ss:$0 sm:$0xff]  ;;  %s1484_s12 = scalar_lea.vmem %s961_s30, 128 }
 0x1a5   :  { %1171 = vmatprep.subr.bf16.mxu1 %v1528_v0  ;;  %p1485_p8 = scmp.ne.s32.totalorder %s961_s30, %s1484_s12  ;;  %p1490_p10 = scmp.lt.s32.totalorder %s1484_s12, %s1484_s12 }
 0x1a7   :  { %p1491_p11 = por %p1490_p10, %p1489_p9 }
 0x1a8   :  { %1172 = vmatpush3.bf16.msra.mxu1 %v1282_v50 }
 0x1a9   :  { %1173 = vmatprep.subr.bf16.mxu1 %v1528_v0  ;;  %p1492_p12 = pnand %p1491_p11, %p1485_p8 }
 0x1ac   :  { %1174 = vmatpush3.bf16.msra.mxu1 %v1283_v51 }
 0x1ad   :  { %1199 = vmatprep.subr.bf16.mxu1 %v1528_v0 }
 0x262   :  { %v377_v42 = vpop.f32.mrb[0].mxu1 }
 0x263   :  { %v378_v43 = vadd.f32 %v982_v41, %v377_v42  ;;  %v1137_v44 = vpop.f32.mrb[1].mxu1 }
 0x264   :  { %v380_v45 = vpop.f32.mrb[2].mxu1 }
 0x265   :  { %v383_v46 = vmul.f32 0.01, %v378_v43  ;;  %v1138_v47 = vpop.f32.mrb[3].mxu1 }
 0x267   :  { %v384_v48 = vmax.f32 %v378_v43, %v383_v46 }
 0x269   :  { %v385_v49 = vpack.c.bf16 %v384_v48, %v384_v48 }
 0x26b   :  { %1156 = vmatmul.mubr.bf16.vlgmr.msra.gmra.mrb[4].mxu0 %v385_v49  ;;  %v1027_v49 = vld [vmem:[%s1884_s14] ss:$0 sm:$0xff] }
 0x26c   :  { %1195 = vmatprep.mubr.msk.bf16.mxu0 %vm1529_vm0, %v1528_v0  ;;  %1180 = vmatpush3.bf16.msra.mxu0 %v1284_v52 }
 0x26d   :  { %1181 = vmatprep.subr.bf16.mxu0 %v1528_v0 }
 0x270   :  { %1182 = vmatpush3.bf16.msra.mxu0 %v1285_v53 }
 0x271   :  { %1183 = vmatprep.subr.bf16.mxu0 %v1528_v0 }
 0x274   :  { %1184 = vmatpush3.bf16.msra.mxu0 %v1286_v54 }
 0x275   :  { %1185 = vmatprep.subr.bf16.mxu0 %v1528_v0 }
 0x278   :  { %1186 = vmatpush3.bf16.msra.mxu0 %v1287_v55 }
 0x279   :  { %1187 = vmatprep.subr.bf16.mxu0 %v1528_v0 }
 0x27c   :  { %1188 = vmatpush3.bf16.msra.mxu0 %v1288_v56 }
 0x27d   :  { %1189 = vmatprep.subr.bf16.mxu0 %v1528_v0 }
 0x280   :  { %1190 = vmatpush3.bf16.msra.mxu0 %v1289_v57 }
 0x281   :  { %1191 = vmatprep.subr.bf16.mxu0 %v1528_v0 }
 0x284   :  { %1192 = vmatpush3.bf16.msra.mxu0 %v1290_v4 }
 0x285   :  { %1193 = vmatprep.subr.bf16.mxu0 %v1528_v0 }
 0x288   :  { %1194 = vmatpush3.bf16.msra.mxu0 %v1291_v5 }
 0x289   :  { %1219 = vmatprep.subr.bf16.mxu0 %v1528_v0 }
 0x33e   :  { %v491_v59 = vpop.f32.mrb[4].mxu0 }
 0x33f   :  { %v492_v60 = vadd.f32 %v991_v58, %v491_v59  ;;  %v1157_v61 = vpop.f32.mrb[5].mxu0 }
 0x340   :  { %v494_v62 = vpop.f32.mrb[6].mxu0 }
 0x341   :  { %v497_v63 = vmul.f32 0.01, %v492_v60  ;;  %v1158_v1 = vpop.f32.mrb[7].mxu0 }
 0x343   :  { %v498_v2 = vmax.f32 %v492_v60, %v497_v63 }
 0x345   :  { %v499_v3 = vpack.c.bf16 %v498_v2, %v498_v2 }
 0x347   :  { %1176 = vmatmul.mubr.bf16.vlgmr.msra.gmra.mrb[4].mxu1 %v499_v3 }
 0x348   :  { %1215 = vmatprep.mubr.msk.bf16.mxu1 %vm1529_vm0, %v1528_v0  ;;  %1200 = vmatpush3.bf16.msra.mxu1 %v1292_v6 }
 0x349   :  { %1201 = vmatprep.subr.bf16.mxu1 %v1528_v0 }
 0x34c   :  { %1202 = vmatpush3.bf16.msra.mxu1 %v1293_v7 }
 0x34d   :  { %1203 = vmatprep.subr.bf16.mxu1 %v1528_v0 }
 0x350   :  { %1204 = vmatpush3.bf16.msra.mxu1 %v1294_v8 }
 0x351   :  { %1205 = vmatprep.subr.bf16.mxu1 %v1528_v0 }
 0x354   :  { %1206 = vmatpush3.bf16.msra.mxu1 %v1295_v9 }
 0x355   :  { %1207 = vmatprep.subr.bf16.mxu1 %v1528_v0 }
 0x358   :  { %1208 = vmatpush3.bf16.msra.mxu1 %v1296_v10 }
 0x359   :  { %1209 = vmatprep.subr.bf16.mxu1 %v1528_v0 }
 0x35c   :  { %1210 = vmatpush3.bf16.msra.mxu1 %v1297_v11 }
 0x35d   :  { %1211 = vmatprep.subr.bf16.mxu1 %v1528_v0 }
 0x360   :  { %1212 = vmatpush3.bf16.msra.mxu1 %v1298_v21 }
 0x361   :  { %1213 = vmatprep.subr.bf16.mxu1 %v1528_v0 }
 0x364   :  { %1214 = vmatpush3.bf16.msra.mxu1 %v1299_v22 }
 0x41a   :  { %v605_v13 = vpop.f32.mrb[4].mxu1 }
 0x41b   :  { %v606_v14 = vadd.f32 %v1000_v12, %v605_v13  ;;  %v1177_v15 = vpop.f32.mrb[5].mxu1 }
 0x41c   :  { %v608_v16 = vpop.f32.mrb[6].mxu1 }
 0x41d   :  { %v611_v17 = vmul.f32 0.01, %v606_v14  ;;  %v1178_v18 = vpop.f32.mrb[7].mxu1 }
 0x41f   :  { %v612_v19 = vmax.f32 %v606_v14, %v611_v17 }
 0x421   :  { %v613_v20 = vpack.c.bf16 %v612_v19, %v612_v19 }
 0x423   :  { %1196 = vmatmul.mubr.bf16.vlgmr.msra.gmra.mrb[8].mxu0 %v613_v20 }
 0x424   :  { %1235 = vmatprep.mubr.msk.bf16.mxu0 %vm1529_vm0, %v1528_v0  ;;  %1220 = vmatpush3.bf16.msra.mxu0 %v1300_v23 }
 0x425   :  { %1221 = vmatprep.subr.bf16.mxu0 %v1528_v0 }
 0x428   :  { %1222 = vmatpush3.bf16.msra.mxu0 %v1301_v24 }
 0x429   :  { %1223 = vmatprep.subr.bf16.mxu0 %v1528_v0 }
 0x42c   :  { %1224 = vmatpush3.bf16.msra.mxu0 %v1302_v25 }
 0x42d   :  { %1225 = vmatprep.subr.bf16.mxu0 %v1528_v0 }
 0x430   :  { %1226 = vmatpush3.bf16.msra.mxu0 %v1303_v26 }
 0x431   :  { %1227 = vmatprep.subr.bf16.mxu0 %v1528_v0 }
 0x434   :  { %1228 = vmatpush3.bf16.msra.mxu0 %v1304_v27 }
 0x435   :  { %1229 = vmatprep.subr.bf16.mxu0 %v1528_v0 }
 0x438   :  { %1230 = vmatpush3.bf16.msra.mxu0 %v1305_v28 }
 0x439   :  { %1231 = vmatprep.subr.bf16.mxu0 %v1528_v0 }
 0x43c   :  { %1232 = vmatpush3.bf16.msra.mxu0 %v1306_v38 }
 0x43d   :  { %1233 = vmatprep.subr.bf16.mxu0 %v1528_v0 }
 0x440   :  { %1234 = vmatpush3.bf16.msra.mxu0 %v1307_v39 }
 0x4f6   :  { %v719_v30 = vpop.f32.mrb[8].mxu0 }
 0x4f7   :  { %v720_v31 = vadd.f32 %v1009_v29, %v719_v30  ;;  %v1197_v32 = vpop.f32.mrb[9].mxu0 }
 0x4f8   :  { %v722_v33 = vpop.f32.mrb[10].mxu0 }
 0x4f9   :  { %v725_v34 = vmul.f32 0.01, %v720_v31  ;;  %v1198_v35 = vpop.f32.mrb[11].mxu0 }
 0x4fb   :  { %v726_v36 = vmax.f32 %v720_v31, %v725_v34 }
 0x4fd   :  { %v727_v37 = vpack.c.bf16 %v726_v36, %v726_v36 }
 0x4ff   :  { %1216 = vmatmul.mubr.bf16.vlgmr.msra.gmra.mrb[8].mxu1 %v727_v37 }
 0x5d2   :  { %v833_v41 = vpop.f32.mrb[8].mxu1 }
 0x5d3   :  { %v834_v42 = vadd.f32 %v1018_v40, %v833_v41  ;;  %v1217_v43 = vpop.f32.mrb[9].mxu1 }
 0x5d4   :  { %v836_v44 = vpop.f32.mrb[10].mxu1 }
 0x5d5   :  { %v839_v45 = vmul.f32 0.01, %v834_v42  ;;  %v1218_v46 = vpop.f32.mrb[11].mxu1 }
 0x5d7   :  { %v840_v47 = vmax.f32 %v834_v42, %v839_v45 }
 0x5d9   :  { %v841_v48 = vpack.c.bf16 %v840_v47, %v840_v47 }
 0x5db   :  { %1236 = vmatmul.mubr.bf16.vlgmr.msra.gmra.mrb[12].mxu0 %v841_v48 }
 0x6ae   :  { %v947_v0 = vpop.f32.mrb[12].mxu0 }
 0x6af   :  { %v948_v50 = vadd.f32 %v1027_v49, %v947_v0  ;;  %v1237_v51 = vpop.f32.mrb[13].mxu0 }
 0x6b0   :  { %v950_v52 = vpop.f32.mrb[14].mxu0 }
 0x6b1   :  { %953 = vst [vmem:[#allocation16] sm:$0xff] %v948_v50  ;;  %v1238_v53 = vpop.f32.mrb[15].mxu0 }
 0x6b2   :  { %1495 = shalt.err (!%p1492_p12)
}
 0x6b3   :  { %s1496_s14 = scalar_lea.hbm %s1885_s15, 128 }
 0x6b4   :  { %p1497_p13 = scmp.ne.s32.totalorder %s1885_s15, %s1496_s14  ;;  %p1500_p0 = scmp.lt.u32.totalorder %s1496_s14, %s1885_s15 }
 0x6b6   :  { %p1502_p1 = pnand %p1500_p0, %p1497_p13 }
 0x6b8   :  { %1505 = shalt.err (!%p1502_p1)
}
 0x6b9   :  { %963 = dma.vmem_to_hbm [thread:$0]  %s961_s30, 128, %s1885_s15, [#allocation4]  }
 0x6ba   :  { %1516 = dma.done.wait [#allocation4], 128  }
 0x6bb   :  { %1517 = vsyncadd [#allocation4], 4294967168 }
 0x6bc   :  { %967 = vsyncpa [#allocation3], 1 }
 0x6bd   :  { %968 = vsyncpa [#allocation6], 1 }
 0x6be   :  { %969 = vsyncpa [#allocation9], 1 }
 0x6bf   :  { %970 = vsyncpa [#allocation12], 1 }
 0x6c0   :  { %971 = vsyncpa [#allocation15], 1 }
 0x6c1   :  { %972 = vsyncpa [#allocation4], 1 }

</bundles_post_ra>
